<compile_context>
chip_gen: v7x
topology: tpu7x:2x2x1
jax: 0.10.0
libtpu: 0.0.40
codegen_flags: <defaults>
</compile_context>

<pallas_src>
import jax
import jax.numpy as jnp
from jax.experimental import pallas as pl
from jax.experimental.pallas import tpu as pltpu

# ---- model config (matches the PyTorch module) ------------------------------
VOCAB_SIZE = 10
EMBEDDING_DIM = 4
HIDDEN_SIZE = 4
OUTPUT_SIZE = 1

LANES = 128  # all packed rows / the output are one full lane-width wide

# Packed weight buffer row layout (every row is LANES wide, f32, zero padded):
#   rows [ROW_TABLE, ROW_TABLE+VOCAB) : fused table  emb @ W_ih + b_ih + b_hh   (lanes 0:H)
#   rows [ROW_WHH,   ROW_WHH+H)       : W_hh                                    (lanes 0:H)
#   rows [ROW_WFC,   ROW_WFC+H)       : W_fc                                    (lanes 0:OUTPUT_SIZE)
#   row   ROW_BFC                     : b_fc                                    (lanes 0:OUTPUT_SIZE)
ROW_TABLE = 0
ROW_WHH = VOCAB_SIZE
ROW_WFC = VOCAB_SIZE + HIDDEN_SIZE
ROW_BFC = VOCAB_SIZE + 2 * HIDDEN_SIZE
N_ROWS = VOCAB_SIZE + 2 * HIDDEN_SIZE + 1      # 19 live rows
N_ROWS_PAD = 24                                # rounded up to a sublane multiple


# ---- Pallas kernel: in-kernel embedding lookup + tanh recurrence + fc -------
def rnn_kernel(tok_ref, packed_ref, out_ref):
    # tok_ref   : SMEM (B, T) int32   -- scalar-prefetched token ids
    # packed_ref: VMEM (N_ROWS_PAD, 128) f32 -- all weights in one operand
    # out_ref   : VMEM (B, 128) f32   -- lane-dense padded output
    B, T = tok_ref.shape
    H = HIDDEN_SIZE

    # Hoist the W_hh row broadcasts out of the unrolled time loop: 4 sublane
    # broadcasts total instead of T*H re-materializations on the XLU.
    w_hh_rows = [
        jnp.broadcast_to(packed_ref[ROW_WHH + k:ROW_WHH + k + 1, :], (B, LANES))
        for k in range(H)
    ]

    # h carried at full 128-lane width; lanes >= H hold exact zeros throughout
    # (packed rows are zero beyond lane H, and tanh(0) == 0).
    h = jnp.zeros((B, LANES), jnp.float32)

    # T is a static compile-time constant: fully unroll the recurrence so the
    # scheduler can overlap the (h-independent) table lookups of step t+1 with
    # the EUP tanh / VPU FMAs of step t.
    for t in range(T):
        # Gather the fused input rows for this timestep (dynamic sublane index
        # taken from the SMEM token table).
        rows = [packed_ref[pl.ds(tok_ref[b, t], 1), :] for b in range(B)]
        acc = jnp.concatenate(rows, axis=0)                     # (B, 128)
        # h @ W_hh as H lane-extract multiply-adds on the VPU (no per-step MXU
        # fill/pop latency on the dependent chain).
        for k in range(H):
            acc = acc + h[:, k:k + 1] * w_hh_rows[k]
        h = jnp.tanh(acc)

    # Final linear layer on the last hidden state, also as VPU FMAs; the store
    # is lane-dense (B, 128) and the wrapper slices to OUTPUT_SIZE.
    out = jnp.broadcast_to(packed_ref[ROW_BFC:ROW_BFC + 1, :], (B, LANES))
    for k in range(H):
        out = out + h[:, k:k + 1] * packed_ref[ROW_WFC + k:ROW_WFC + k + 1, :]
    out_ref[...] = out


# ---- weight packing (done once per weight set, outside the hot path) --------
def prepare_packed_weights(params):
    emb_table, w_ih, w_hh, b_ih, b_hh, w_fc, b_fc = params
    # Fuse embedding + input projection + both RNN biases into one table.
    fused = emb_table.astype(jnp.float32) @ w_ih + (b_ih + b_hh)   # (V, H)

    packed = jnp.zeros((N_ROWS_PAD, LANES), jnp.float32)
    packed = packed.at[ROW_TABLE:ROW_TABLE + VOCAB_SIZE, :HIDDEN_SIZE].set(fused)
    packed = packed.at[ROW_WHH:ROW_WHH + HIDDEN_SIZE, :HIDDEN_SIZE].set(w_hh)
    packed = packed.at[ROW_WFC:ROW_WFC + HIDDEN_SIZE, :OUTPUT_SIZE].set(w_fc)
    packed = packed.at[ROW_BFC:ROW_BFC + 1, :OUTPUT_SIZE].set(b_fc)
    return packed


# ---- forward ----------------------------------------------------------------
@jax.jit
def rnn1_forward(tokens, packed):
    """tokens: (B, T) int32; packed: (N_ROWS_PAD, 128) f32.
    Returns (B, OUTPUT_SIZE) float32."""
    B, T = tokens.shape

    grid_spec = pltpu.PrefetchScalarGridSpec(
        num_scalar_prefetch=1,                       # tokens -> SMEM
        grid=(1,),
        in_specs=[pl.BlockSpec((N_ROWS_PAD, LANES), lambda i, tok: (0, 0))],
        out_specs=pl.BlockSpec((B, LANES), lambda i, tok: (0, 0)),
    )

    out_pad = pl.pallas_call(
        rnn_kernel,
        out_shape=jax.ShapeDtypeStruct((B, LANES), jnp.float32),
        grid_spec=grid_spec,
        compiler_params=pltpu.CompilerParams(
            dimension_semantics=("arbitrary",)),
    )(tokens.astype(jnp.int32), packed)

    return out_pad[:, :OUTPUT_SIZE]


# ---- params & pure-JAX reference ---------------------------------------------
def init_params(key):
    ks = jax.random.split(key, 7)
    bound = 1.0 / jnp.sqrt(HIDDEN_SIZE)
    emb_table = jax.random.normal(ks[0], (VOCAB_SIZE, EMBEDDING_DIM),
                                  jnp.float32)
    # Stored pre-transposed relative to PyTorch's (H, E)/(H, H)/(O, H).
    w_ih = jax.random.uniform(ks[1], (EMBEDDING_DIM, HIDDEN_SIZE), jnp.float32,
                              -bound, bound)
    w_hh = jax.random.uniform(ks[2], (HIDDEN_SIZE, HIDDEN_SIZE), jnp.float32,
                              -bound, bound)
    b_ih = jax.random.uniform(ks[3], (1, HIDDEN_SIZE), jnp.float32,
                              -bound, bound)
    b_hh = jax.random.uniform(ks[4], (1, HIDDEN_SIZE), jnp.float32,
                              -bound, bound)
    w_fc = jax.random.uniform(ks[5], (HIDDEN_SIZE, OUTPUT_SIZE), jnp.float32,
                              -bound, bound)
    b_fc = jax.random.uniform(ks[6], (1, OUTPUT_SIZE), jnp.float32,
                              -bound, bound)
    return emb_table, w_ih, w_hh, b_ih, b_hh, w_fc, b_fc


def reference_forward(tokens, params):
    """Pure-JAX reference with identical semantics (sanity check)."""
    emb_table, w_ih, w_hh, b_ih, b_hh, w_fc, b_fc = params
    x = jnp.take(emb_table, tokens, axis=0)              # (B, T, E)
    B, T, _ = x.shape
    h = jnp.zeros((B, HIDDEN_SIZE), jnp.float32)
    for t in range(T):
        h = jnp.tanh(x[:, t, :] @ w_ih + h @ w_hh + b_ih + b_hh)
    return h @ w_fc + b_fc


if __name__ == "__main__":
    key = jax.random.PRNGKey(0)
    k_tok, k_par = jax.random.split(key)

    B, T = 2, 8
    tokens = jax.random.randint(k_tok, (B, T), 0, VOCAB_SIZE, dtype=jnp.int32)
    params = init_params(k_par)
    packed = prepare_packed_weights(params)

    out = rnn1_forward(tokens, packed)
    out = jax.block_until_ready(out)

    ref = reference_forward(tokens, params)
    assert out.shape == (B, OUTPUT_SIZE)
    assert jnp.allclose(out, ref, atol=1e-5, rtol=1e-5)

    print("KERNEL_OK")
</pallas_src>

<mosaic_0001>
module attributes {stable_mosaic.version = 11 : i64} {
  func.func @rnn_kernel(%arg0: i32, %arg1: memref<2x8xi32, #tpu.memory_space<smem>>, %arg2: memref<24x128xf32, #tpu.memory_space<vmem>>, %arg3: memref<2x128xf32, #tpu.memory_space<vmem>>) attributes {dimension_semantics = [#tpu.dimension_semantics<arbitrary>], iteration_bounds = array<i64: 1>, scalar_prefetch = 1 : i64, scratch_operands = 0 : i64, tpu.core_type = #tpu.core_type<tc>, window_params = [{pipeline_mode = #tpu.pipeline_mode<synchronous>, transform_indices = @transform_0, window_bounds = array<i64: 24, 128>}, {pipeline_mode = #tpu.pipeline_mode<synchronous>, transform_indices = @transform_1, window_bounds = array<i64: 2, 128>}]} {
    %c10 = arith.constant 10 : index
    %c0 = arith.constant 0 : index
    %0 = vector.load %arg2[%c10, %c0] : memref<24x128xf32, #tpu.memory_space<vmem>>, vector<1x128xf32>
    %1 = vector.shape_cast %0 : vector<1x128xf32> to vector<1x128xf32>
    %2 = vector.broadcast %1 : vector<1x128xf32> to vector<2x128xf32>
    %c11 = arith.constant 11 : index
    %c0_0 = arith.constant 0 : index
    %3 = vector.load %arg2[%c11, %c0_0] : memref<24x128xf32, #tpu.memory_space<vmem>>, vector<1x128xf32>
    %4 = vector.shape_cast %3 : vector<1x128xf32> to vector<1x128xf32>
    %5 = vector.broadcast %4 : vector<1x128xf32> to vector<2x128xf32>
    %c12 = arith.constant 12 : index
    %c0_1 = arith.constant 0 : index
    %6 = vector.load %arg2[%c12, %c0_1] : memref<24x128xf32, #tpu.memory_space<vmem>>, vector<1x128xf32>
    %7 = vector.shape_cast %6 : vector<1x128xf32> to vector<1x128xf32>
    %8 = vector.broadcast %7 : vector<1x128xf32> to vector<2x128xf32>
    %c13 = arith.constant 13 : index
    %c0_2 = arith.constant 0 : index
    %9 = vector.load %arg2[%c13, %c0_2] : memref<24x128xf32, #tpu.memory_space<vmem>>, vector<1x128xf32>
    %10 = vector.shape_cast %9 : vector<1x128xf32> to vector<1x128xf32>
    %11 = vector.broadcast %10 : vector<1x128xf32> to vector<2x128xf32>
    %cst = arith.constant 0.000000e+00 : f32
    %12 = vector.broadcast %cst : f32 to vector<2x128xf32>
    %c0_3 = arith.constant 0 : index
    %c0_4 = arith.constant 0 : index
    %13 = memref.load %arg1[%c0_3, %c0_4] : memref<2x8xi32, #tpu.memory_space<smem>>
    %14 = arith.index_cast %13 : i32 to index
    %c0_5 = arith.constant 0 : index
    %15 = vector.load %arg2[%14, %c0_5] : memref<24x128xf32, #tpu.memory_space<vmem>>, vector<1x128xf32>
    %c1 = arith.constant 1 : index
    %c0_6 = arith.constant 0 : index
    %16 = memref.load %arg1[%c1, %c0_6] : memref<2x8xi32, #tpu.memory_space<smem>>
    %17 = arith.index_cast %16 : i32 to index
    %c0_7 = arith.constant 0 : index
    %18 = vector.load %arg2[%17, %c0_7] : memref<24x128xf32, #tpu.memory_space<vmem>>, vector<1x128xf32>
    %19 = tpu.concatenate %15, %18 in 0 : vector<1x128xf32>, vector<1x128xf32> -> vector<2x128xf32>
    %20 = vector.extract_strided_slice %12 {offsets = [0, 0], sizes = [2, 1], strides = [1, 1]} : vector<2x128xf32> to vector<2x1xf32>
    %21 = vector.broadcast %20 : vector<2x1xf32> to vector<2x128xf32>
    %22 = arith.mulf %21, %2 : vector<2x128xf32>
    %23 = arith.addf %19, %22 : vector<2x128xf32>
    %24 = vector.extract_strided_slice %12 {offsets = [0, 1], sizes = [2, 1], strides = [1, 1]} : vector<2x128xf32> to vector<2x1xf32>
    %25 = vector.broadcast %24 : vector<2x1xf32> to vector<2x128xf32>
    %26 = arith.mulf %25, %5 : vector<2x128xf32>
    %27 = arith.addf %23, %26 : vector<2x128xf32>
    %28 = vector.extract_strided_slice %12 {offsets = [0, 2], sizes = [2, 1], strides = [1, 1]} : vector<2x128xf32> to vector<2x1xf32>
    %29 = vector.broadcast %28 : vector<2x1xf32> to vector<2x128xf32>
    %30 = arith.mulf %29, %8 : vector<2x128xf32>
    %31 = arith.addf %27, %30 : vector<2x128xf32>
    %32 = vector.extract_strided_slice %12 {offsets = [0, 3], sizes = [2, 1], strides = [1, 1]} : vector<2x128xf32> to vector<2x1xf32>
    %33 = vector.broadcast %32 : vector<2x1xf32> to vector<2x128xf32>
    %34 = arith.mulf %33, %11 : vector<2x128xf32>
    %35 = arith.addf %31, %34 : vector<2x128xf32>
    %36 = math.tanh %35 : vector<2x128xf32>
    %c0_8 = arith.constant 0 : index
    %c1_9 = arith.constant 1 : index
    %37 = memref.load %arg1[%c0_8, %c1_9] : memref<2x8xi32, #tpu.memory_space<smem>>
    %38 = arith.index_cast %37 : i32 to index
    %c0_10 = arith.constant 0 : index
    %39 = vector.load %arg2[%38, %c0_10] : memref<24x128xf32, #tpu.memory_space<vmem>>, vector<1x128xf32>
    %c1_11 = arith.constant 1 : index
    %c1_12 = arith.constant 1 : index
    %40 = memref.load %arg1[%c1_11, %c1_12] : memref<2x8xi32, #tpu.memory_space<smem>>
    %41 = arith.index_cast %40 : i32 to index
    %c0_13 = arith.constant 0 : index
    %42 = vector.load %arg2[%41, %c0_13] : memref<24x128xf32, #tpu.memory_space<vmem>>, vector<1x128xf32>
    %43 = tpu.concatenate %39, %42 in 0 : vector<1x128xf32>, vector<1x128xf32> -> vector<2x128xf32>
    %44 = vector.extract_strided_slice %36 {offsets = [0, 0], sizes = [2, 1], strides = [1, 1]} : vector<2x128xf32> to vector<2x1xf32>
    %45 = vector.broadcast %44 : vector<2x1xf32> to vector<2x128xf32>
    %46 = arith.mulf %45, %2 : vector<2x128xf32>
    %47 = arith.addf %43, %46 : vector<2x128xf32>
    %48 = vector.extract_strided_slice %36 {offsets = [0, 1], sizes = [2, 1], strides = [1, 1]} : vector<2x128xf32> to vector<2x1xf32>
    %49 = vector.broadcast %48 : vector<2x1xf32> to vector<2x128xf32>
    %50 = arith.mulf %49, %5 : vector<2x128xf32>
    %51 = arith.addf %47, %50 : vector<2x128xf32>
    %52 = vector.extract_strided_slice %36 {offsets = [0, 2], sizes = [2, 1], strides = [1, 1]} : vector<2x128xf32> to vector<2x1xf32>
    %53 = vector.broadcast %52 : vector<2x1xf32> to vector<2x128xf32>
    %54 = arith.mulf %53, %8 : vector<2x128xf32>
    %55 = arith.addf %51, %54 : vector<2x128xf32>
    %56 = vector.extract_strided_slice %36 {offsets = [0, 3], sizes = [2, 1], strides = [1, 1]} : vector<2x128xf32> to vector<2x1xf32>
    %57 = vector.broadcast %56 : vector<2x1xf32> to vector<2x128xf32>
    %58 = arith.mulf %57, %11 : vector<2x128xf32>
    %59 = arith.addf %55, %58 : vector<2x128xf32>
    %60 = math.tanh %59 : vector<2x128xf32>
    %c0_14 = arith.constant 0 : index
    %c2 = arith.constant 2 : index
    %61 = memref.load %arg1[%c0_14, %c2] : memref<2x8xi32, #tpu.memory_space<smem>>
    %62 = arith.index_cast %61 : i32 to index
    %c0_15 = arith.constant 0 : index
    %63 = vector.load %arg2[%62, %c0_15] : memref<24x128xf32, #tpu.memory_space<vmem>>, vector<1x128xf32>
    %c1_16 = arith.constant 1 : index
    %c2_17 = arith.constant 2 : index
    %64 = memref.load %arg1[%c1_16, %c2_17] : memref<2x8xi32, #tpu.memory_space<smem>>
    %65 = arith.index_cast %64 : i32 to index
    %c0_18 = arith.constant 0 : index
    %66 = vector.load %arg2[%65, %c0_18] : memref<24x128xf32, #tpu.memory_space<vmem>>, vector<1x128xf32>
    %67 = tpu.concatenate %63, %66 in 0 : vector<1x128xf32>, vector<1x128xf32> -> vector<2x128xf32>
    %68 = vector.extract_strided_slice %60 {offsets = [0, 0], sizes = [2, 1], strides = [1, 1]} : vector<2x128xf32> to vector<2x1xf32>
    %69 = vector.broadcast %68 : vector<2x1xf32> to vector<2x128xf32>
    %70 = arith.mulf %69, %2 : vector<2x128xf32>
    %71 = arith.addf %67, %70 : vector<2x128xf32>
    %72 = vector.extract_strided_slice %60 {offsets = [0, 1], sizes = [2, 1], strides = [1, 1]} : vector<2x128xf32> to vector<2x1xf32>
    %73 = vector.broadcast %72 : vector<2x1xf32> to vector<2x128xf32>
    %74 = arith.mulf %73, %5 : vector<2x128xf32>
    %75 = arith.addf %71, %74 : vector<2x128xf32>
    %76 = vector.extract_strided_slice %60 {offsets = [0, 2], sizes = [2, 1], strides = [1, 1]} : vector<2x128xf32> to vector<2x1xf32>
    %77 = vector.broadcast %76 : vector<2x1xf32> to vector<2x128xf32>
    %78 = arith.mulf %77, %8 : vector<2x128xf32>
    %79 = arith.addf %75, %78 : vector<2x128xf32>
    %80 = vector.extract_strided_slice %60 {offsets = [0, 3], sizes = [2, 1], strides = [1, 1]} : vector<2x128xf32> to vector<2x1xf32>
    %81 = vector.broadcast %80 : vector<2x1xf32> to vector<2x128xf32>
    %82 = arith.mulf %81, %11 : vector<2x128xf32>
    %83 = arith.addf %79, %82 : vector<2x128xf32>
    %84 = math.tanh %83 : vector<2x128xf32>
    %c0_19 = arith.constant 0 : index
    %c3 = arith.constant 3 : index
    %85 = memref.load %arg1[%c0_19, %c3] : memref<2x8xi32, #tpu.memory_space<smem>>
    %86 = arith.index_cast %85 : i32 to index
    %c0_20 = arith.constant 0 : index
    %87 = vector.load %arg2[%86, %c0_20] : memref<24x128xf32, #tpu.memory_space<vmem>>, vector<1x128xf32>
    %c1_21 = arith.constant 1 : index
    %c3_22 = arith.constant 3 : index
    %88 = memref.load %arg1[%c1_21, %c3_22] : memref<2x8xi32, #tpu.memory_space<smem>>
    %89 = arith.index_cast %88 : i32 to index
    %c0_23 = arith.constant 0 : index
    %90 = vector.load %arg2[%89, %c0_23] : memref<24x128xf32, #tpu.memory_space<vmem>>, vector<1x128xf32>
    %91 = tpu.concatenate %87, %90 in 0 : vector<1x128xf32>, vector<1x128xf32> -> vector<2x128xf32>
    %92 = vector.extract_strided_slice %84 {offsets = [0, 0], sizes = [2, 1], strides = [1, 1]} : vector<2x128xf32> to vector<2x1xf32>
    %93 = vector.broadcast %92 : vector<2x1xf32> to vector<2x128xf32>
    %94 = arith.mulf %93, %2 : vector<2x128xf32>
    %95 = arith.addf %91, %94 : vector<2x128xf32>
    %96 = vector.extract_strided_slice %84 {offsets = [0, 1], sizes = [2, 1], strides = [1, 1]} : vector<2x128xf32> to vector<2x1xf32>
    %97 = vector.broadcast %96 : vector<2x1xf32> to vector<2x128xf32>
    %98 = arith.mulf %97, %5 : vector<2x128xf32>
    %99 = arith.addf %95, %98 : vector<2x128xf32>
    %100 = vector.extract_strided_slice %84 {offsets = [0, 2], sizes = [2, 1], strides = [1, 1]} : vector<2x128xf32> to vector<2x1xf32>
    %101 = vector.broadcast %100 : vector<2x1xf32> to vector<2x128xf32>
    %102 = arith.mulf %101, %8 : vector<2x128xf32>
    %103 = arith.addf %99, %102 : vector<2x128xf32>
    %104 = vector.extract_strided_slice %84 {offsets = [0, 3], sizes = [2, 1], strides = [1, 1]} : vector<2x128xf32> to vector<2x1xf32>
    %105 = vector.broadcast %104 : vector<2x1xf32> to vector<2x128xf32>
    %106 = arith.mulf %105, %11 : vector<2x128xf32>
    %107 = arith.addf %103, %106 : vector<2x128xf32>
    %108 = math.tanh %107 : vector<2x128xf32>
    %c0_24 = arith.constant 0 : index
    %c4 = arith.constant 4 : index
    %109 = memref.load %arg1[%c0_24, %c4] : memref<2x8xi32, #tpu.memory_space<smem>>
    %110 = arith.index_cast %109 : i32 to index
    %c0_25 = arith.constant 0 : index
    %111 = vector.load %arg2[%110, %c0_25] : memref<24x128xf32, #tpu.memory_space<vmem>>, vector<1x128xf32>
    %c1_26 = arith.constant 1 : index
    %c4_27 = arith.constant 4 : index
    %112 = memref.load %arg1[%c1_26, %c4_27] : memref<2x8xi32, #tpu.memory_space<smem>>
    %113 = arith.index_cast %112 : i32 to index
    %c0_28 = arith.constant 0 : index
    %114 = vector.load %arg2[%113, %c0_28] : memref<24x128xf32, #tpu.memory_space<vmem>>, vector<1x128xf32>
    %115 = tpu.concatenate %111, %114 in 0 : vector<1x128xf32>, vector<1x128xf32> -> vector<2x128xf32>
    %116 = vector.extract_strided_slice %108 {offsets = [0, 0], sizes = [2, 1], strides = [1, 1]} : vector<2x128xf32> to vector<2x1xf32>
    %117 = vector.broadcast %116 : vector<2x1xf32> to vector<2x128xf32>
    %118 = arith.mulf %117, %2 : vector<2x128xf32>
    %119 = arith.addf %115, %118 : vector<2x128xf32>
    %120 = vector.extract_strided_slice %108 {offsets = [0, 1], sizes = [2, 1], strides = [1, 1]} : vector<2x128xf32> to vector<2x1xf32>
    %121 = vector.broadcast %120 : vector<2x1xf32> to vector<2x128xf32>
    %122 = arith.mulf %121, %5 : vector<2x128xf32>
    %123 = arith.addf %119, %122 : vector<2x128xf32>
    %124 = vector.extract_strided_slice %108 {offsets = [0, 2], sizes = [2, 1], strides = [1, 1]} : vector<2x128xf32> to vector<2x1xf32>
    %125 = vector.broadcast %124 : vector<2x1xf32> to vector<2x128xf32>
    %126 = arith.mulf %125, %8 : vector<2x128xf32>
    %127 = arith.addf %123, %126 : vector<2x128xf32>
    %128 = vector.extract_strided_slice %108 {offsets = [0, 3], sizes = [2, 1], strides = [1, 1]} : vector<2x128xf32> to vector<2x1xf32>
    %129 = vector.broadcast %128 : vector<2x1xf32> to vector<2x128xf32>
    %130 = arith.mulf %129, %11 : vector<2x128xf32>
    %131 = arith.addf %127, %130 : vector<2x128xf32>
    %132 = math.tanh %131 : vector<2x128xf32>
    %c0_29 = arith.constant 0 : index
    %c5 = arith.constant 5 : index
    %133 = memref.load %arg1[%c0_29, %c5] : memref<2x8xi32, #tpu.memory_space<smem>>
    %134 = arith.index_cast %133 : i32 to index
    %c0_30 = arith.constant 0 : index
    %135 = vector.load %arg2[%134, %c0_30] : memref<24x128xf32, #tpu.memory_space<vmem>>, vector<1x128xf32>
    %c1_31 = arith.constant 1 : index
    %c5_32 = arith.constant 5 : index
    %136 = memref.load %arg1[%c1_31, %c5_32] : memref<2x8xi32, #tpu.memory_space<smem>>
    %137 = arith.index_cast %136 : i32 to index
    %c0_33 = arith.constant 0 : index
    %138 = vector.load %arg2[%137, %c0_33] : memref<24x128xf32, #tpu.memory_space<vmem>>, vector<1x128xf32>
    %139 = tpu.concatenate %135, %138 in 0 : vector<1x128xf32>, vector<1x128xf32> -> vector<2x128xf32>
    %140 = vector.extract_strided_slice %132 {offsets = [0, 0], sizes = [2, 1], strides = [1, 1]} : vector<2x128xf32> to vector<2x1xf32>
    %141 = vector.broadcast %140 : vector<2x1xf32> to vector<2x128xf32>
    %142 = arith.mulf %141, %2 : vector<2x128xf32>
    %143 = arith.addf %139, %142 : vector<2x128xf32>
    %144 = vector.extract_strided_slice %132 {offsets = [0, 1], sizes = [2, 1], strides = [1, 1]} : vector<2x128xf32> to vector<2x1xf32>
    %145 = vector.broadcast %144 : vector<2x1xf32> to vector<2x128xf32>
    %146 = arith.mulf %145, %5 : vector<2x128xf32>
    %147 = arith.addf %143, %146 : vector<2x128xf32>
    %148 = vector.extract_strided_slice %132 {offsets = [0, 2], sizes = [2, 1], strides = [1, 1]} : vector<2x128xf32> to vector<2x1xf32>
    %149 = vector.broadcast %148 : vector<2x1xf32> to vector<2x128xf32>
    %150 = arith.mulf %149, %8 : vector<2x128xf32>
    %151 = arith.addf %147, %150 : vector<2x128xf32>
    %152 = vector.extract_strided_slice %132 {offsets = [0, 3], sizes = [2, 1], strides = [1, 1]} : vector<2x128xf32> to vector<2x1xf32>
    %153 = vector.broadcast %152 : vector<2x1xf32> to vector<2x128xf32>
    %154 = arith.mulf %153, %11 : vector<2x128xf32>
    %155 = arith.addf %151, %154 : vector<2x128xf32>
    %156 = math.tanh %155 : vector<2x128xf32>
    %c0_34 = arith.constant 0 : index
    %c6 = arith.constant 6 : index
    %157 = memref.load %arg1[%c0_34, %c6] : memref<2x8xi32, #tpu.memory_space<smem>>
    %158 = arith.index_cast %157 : i32 to index
    %c0_35 = arith.constant 0 : index
    %159 = vector.load %arg2[%158, %c0_35] : memref<24x128xf32, #tpu.memory_space<vmem>>, vector<1x128xf32>
    %c1_36 = arith.constant 1 : index
    %c6_37 = arith.constant 6 : index
    %160 = memref.load %arg1[%c1_36, %c6_37] : memref<2x8xi32, #tpu.memory_space<smem>>
    %161 = arith.index_cast %160 : i32 to index
    %c0_38 = arith.constant 0 : index
    %162 = vector.load %arg2[%161, %c0_38] : memref<24x128xf32, #tpu.memory_space<vmem>>, vector<1x128xf32>
    %163 = tpu.concatenate %159, %162 in 0 : vector<1x128xf32>, vector<1x128xf32> -> vector<2x128xf32>
    %164 = vector.extract_strided_slice %156 {offsets = [0, 0], sizes = [2, 1], strides = [1, 1]} : vector<2x128xf32> to vector<2x1xf32>
    %165 = vector.broadcast %164 : vector<2x1xf32> to vector<2x128xf32>
    %166 = arith.mulf %165, %2 : vector<2x128xf32>
    %167 = arith.addf %163, %166 : vector<2x128xf32>
    %168 = vector.extract_strided_slice %156 {offsets = [0, 1], sizes = [2, 1], strides = [1, 1]} : vector<2x128xf32> to vector<2x1xf32>
    %169 = vector.broadcast %168 : vector<2x1xf32> to vector<2x128xf32>
    %170 = arith.mulf %169, %5 : vector<2x128xf32>
    %171 = arith.addf %167, %170 : vector<2x128xf32>
    %172 = vector.extract_strided_slice %156 {offsets = [0, 2], sizes = [2, 1], strides = [1, 1]} : vector<2x128xf32> to vector<2x1xf32>
    %173 = vector.broadcast %172 : vector<2x1xf32> to vector<2x128xf32>
    %174 = arith.mulf %173, %8 : vector<2x128xf32>
    %175 = arith.addf %171, %174 : vector<2x128xf32>
    %176 = vector.extract_strided_slice %156 {offsets = [0, 3], sizes = [2, 1], strides = [1, 1]} : vector<2x128xf32> to vector<2x1xf32>
    %177 = vector.broadcast %176 : vector<2x1xf32> to vector<2x128xf32>
    %178 = arith.mulf %177, %11 : vector<2x128xf32>
    %179 = arith.addf %175, %178 : vector<2x128xf32>
    %180 = math.tanh %179 : vector<2x128xf32>
    %c0_39 = arith.constant 0 : index
    %c7 = arith.constant 7 : index
    %181 = memref.load %arg1[%c0_39, %c7] : memref<2x8xi32, #tpu.memory_space<smem>>
    %182 = arith.index_cast %181 : i32 to index
    %c0_40 = arith.constant 0 : index
    %183 = vector.load %arg2[%182, %c0_40] : memref<24x128xf32, #tpu.memory_space<vmem>>, vector<1x128xf32>
    %c1_41 = arith.constant 1 : index
    %c7_42 = arith.constant 7 : index
    %184 = memref.load %arg1[%c1_41, %c7_42] : memref<2x8xi32, #tpu.memory_space<smem>>
    %185 = arith.index_cast %184 : i32 to index
    %c0_43 = arith.constant 0 : index
    %186 = vector.load %arg2[%185, %c0_43] : memref<24x128xf32, #tpu.memory_space<vmem>>, vector<1x128xf32>
    %187 = tpu.concatenate %183, %186 in 0 : vector<1x128xf32>, vector<1x128xf32> -> vector<2x128xf32>
    %188 = vector.extract_strided_slice %180 {offsets = [0, 0], sizes = [2, 1], strides = [1, 1]} : vector<2x128xf32> to vector<2x1xf32>
    %189 = vector.broadcast %188 : vector<2x1xf32> to vector<2x128xf32>
    %190 = arith.mulf %189, %2 : vector<2x128xf32>
    %191 = arith.addf %187, %190 : vector<2x128xf32>
    %192 = vector.extract_strided_slice %180 {offsets = [0, 1], sizes = [2, 1], strides = [1, 1]} : vector<2x128xf32> to vector<2x1xf32>
    %193 = vector.broadcast %192 : vector<2x1xf32> to vector<2x128xf32>
    %194 = arith.mulf %193, %5 : vector<2x128xf32>
    %195 = arith.addf %191, %194 : vector<2x128xf32>
    %196 = vector.extract_strided_slice %180 {offsets = [0, 2], sizes = [2, 1], strides = [1, 1]} : vector<2x128xf32> to vector<2x1xf32>
    %197 = vector.broadcast %196 : vector<2x1xf32> to vector<2x128xf32>
    %198 = arith.mulf %197, %8 : vector<2x128xf32>
    %199 = arith.addf %195, %198 : vector<2x128xf32>
    %200 = vector.extract_strided_slice %180 {offsets = [0, 3], sizes = [2, 1], strides = [1, 1]} : vector<2x128xf32> to vector<2x1xf32>
    %201 = vector.broadcast %200 : vector<2x1xf32> to vector<2x128xf32>
    %202 = arith.mulf %201, %11 : vector<2x128xf32>
    %203 = arith.addf %199, %202 : vector<2x128xf32>
    %204 = math.tanh %203 : vector<2x128xf32>
    %c18 = arith.constant 18 : index
    %c0_44 = arith.constant 0 : index
    %205 = vector.load %arg2[%c18, %c0_44] : memref<24x128xf32, #tpu.memory_space<vmem>>, vector<1x128xf32>
    %206 = vector.shape_cast %205 : vector<1x128xf32> to vector<1x128xf32>
    %207 = vector.broadcast %206 : vector<1x128xf32> to vector<2x128xf32>
    %208 = vector.extract_strided_slice %204 {offsets = [0, 0], sizes = [2, 1], strides = [1, 1]} : vector<2x128xf32> to vector<2x1xf32>
    %c14 = arith.constant 14 : index
    %c0_45 = arith.constant 0 : index
    %209 = vector.load %arg2[%c14, %c0_45] : memref<24x128xf32, #tpu.memory_space<vmem>>, vector<1x128xf32>
    %210 = vector.broadcast %208 : vector<2x1xf32> to vector<2x128xf32>
    %211 = vector.broadcast %209 : vector<1x128xf32> to vector<2x128xf32>
    %212 = arith.mulf %210, %211 : vector<2x128xf32>
    %213 = arith.addf %207, %212 : vector<2x128xf32>
    %214 = vector.extract_strided_slice %204 {offsets = [0, 1], sizes = [2, 1], strides = [1, 1]} : vector<2x128xf32> to vector<2x1xf32>
    %c15 = arith.constant 15 : index
    %c0_46 = arith.constant 0 : index
    %215 = vector.load %arg2[%c15, %c0_46] : memref<24x128xf32, #tpu.memory_space<vmem>>, vector<1x128xf32>
    %216 = vector.broadcast %214 : vector<2x1xf32> to vector<2x128xf32>
    %217 = vector.broadcast %215 : vector<1x128xf32> to vector<2x128xf32>
    %218 = arith.mulf %216, %217 : vector<2x128xf32>
    %219 = arith.addf %213, %218 : vector<2x128xf32>
    %220 = vector.extract_strided_slice %204 {offsets = [0, 2], sizes = [2, 1], strides = [1, 1]} : vector<2x128xf32> to vector<2x1xf32>
    %c16 = arith.constant 16 : index
    %c0_47 = arith.constant 0 : index
    %221 = vector.load %arg2[%c16, %c0_47] : memref<24x128xf32, #tpu.memory_space<vmem>>, vector<1x128xf32>
    %222 = vector.broadcast %220 : vector<2x1xf32> to vector<2x128xf32>
    %223 = vector.broadcast %221 : vector<1x128xf32> to vector<2x128xf32>
    %224 = arith.mulf %222, %223 : vector<2x128xf32>
    %225 = arith.addf %219, %224 : vector<2x128xf32>
    %226 = vector.extract_strided_slice %204 {offsets = [0, 3], sizes = [2, 1], strides = [1, 1]} : vector<2x128xf32> to vector<2x1xf32>
    %c17 = arith.constant 17 : index
    %c0_48 = arith.constant 0 : index
    %227 = vector.load %arg2[%c17, %c0_48] : memref<24x128xf32, #tpu.memory_space<vmem>>, vector<1x128xf32>
    %228 = vector.broadcast %226 : vector<2x1xf32> to vector<2x128xf32>
    %229 = vector.broadcast %227 : vector<1x128xf32> to vector<2x128xf32>
    %230 = arith.mulf %228, %229 : vector<2x128xf32>
    %231 = arith.addf %225, %230 : vector<2x128xf32>
    %c0_49 = arith.constant 0 : index
    %c0_50 = arith.constant 0 : index
    %232 = vector.load %arg3[%c0_49, %c0_50] : memref<2x128xf32, #tpu.memory_space<vmem>>, vector<2x128xf32>
    tpu.vector_store %arg3[%c0_49, %c0_50], %231 {strides = array<i32>} : memref<2x128xf32, #tpu.memory_space<vmem>>, vector<2x128xf32>,
    return
  }
  func.func @transform_0(%arg0: i32, %arg1: memref<2x8xi32, #tpu.memory_space<smem>>) -> (i32, i32) {
    %c0_i32 = arith.constant 0 : i32
    %c0_i32_0 = arith.constant 0 : i32
    %c0_i32_1 = arith.constant 0 : i32
    return %c0_i32, %c0_i32_0 : i32, i32
  }
  func.func @transform_1(%arg0: i32, %arg1: memref<2x8xi32, #tpu.memory_space<smem>>) -> (i32, i32) {
    %c0_i32 = arith.constant 0 : i32
    %c0_i32_0 = arith.constant 0 : i32
    %c0_i32_1 = arith.constant 0 : i32
    return %c0_i32, %c0_i32_0 : i32, i32
  }
}

</mosaic_0001>

<bundles_post_ra>
// kernel: rnn1_forward.1
= control target key start
LH: loop header
LB: loop body
LE: loop exit
PB: predicated region body
PF: predicated region fallthrough
CT: control target
= control target key end

     0   :  { %s635_s0 = inlined_call_operand.hbm [shape: s32[2,8], index: 0, kind: input, shape index: {}]   ;;  %s636_s1 = inlined_call_operand.hbm [shape: f32[24,128], index: 1, kind: input, shape index: {}]   ;;  %s637_s2 = inlined_call_operand.vmem [shape: f32[2,128], index: 2, kind: output, shape index: {}]  }
   0x1   :  { %s470_s11 = scalar_lea.hbm %s635_s0, 32 }
   0x2   :  { %p471_p0 = scmp.ne.s32.totalorder %s635_s0, %s470_s11  ;;  %p474_p1 = scmp.lt.u32.totalorder %s470_s11, %s635_s0 }
   0x4   :  { %p476_p2 = pnand %p474_p1, %p471_p0 }
   0x6   :  { %479 = shalt.err (!%p476_p2)  }
   0x7   :  { %s506_s16 = smov [#allocation3]  }
   0x8   :  { %8 = dma.hbm_to_smem %s635_s0, 32, %s506_s16, [#allocation2] }
   0x9   :  { %502 = dma.done.wait [#allocation2], 32 }
   0xa   :  { %503 = vsyncadd [#allocation2], 4294967264 }
   0xb   :  { %10 = sfence }
   0xc   :  { %11 = vsyncpa [#allocation5], 0  ;;  %s507_s19 = smov [#allocation4]   ;;  %s480_s23 = scalar_lea.hbm %s636_s1, 384 }
   0xd   :  { %s17_s20 = sshll.u32 %s507_s19, 4  ;;  %p481_p3 = scmp.ne.s32.totalorder %s636_s1, %s480_s23  ;;  %s18_s20 = int_to_ptr.vmem [resolvable:$true] %s17_s20 }
   0xe   :  { %p484_p4 = scmp.lt.u32.totalorder %s480_s23, %s636_s1 }
  0x10   :  { %p486_p5 = pnand %p484_p4, %p481_p3 }
  0x12   :  { %489 = shalt.err (!%p486_p5)
}
  0x13   :  { %s490_s0 = scalar_lea.vmem %s18_s20, 384  ;;  %p495_p7 = scmp.lt.s32.totalorder %s18_s20, %s18_s20 }
  0x14   :  { %p491_p6 = scmp.ne.s32.totalorder %s18_s20, %s490_s0  ;;  %p496_p8 = scmp.lt.s32.totalorder %s490_s0, %s490_s0 }
  0x16   :  { %p497_p9 = por %p496_p8, %p495_p7 }
  0x18   :  { %p498_p10 = pnand %p497_p9, %p491_p6 }
  0x1a   :  { %501 = shalt.err (!%p498_p10)
}
  0x1b   :  { %s508_s28 = smov 128   ;;  %s509_s29 = smov 8  }
  0x1c   :  { %23 = dma.hbm_to_vmem [thread:$0]  %s636_s1, 384, %s18_s20, [#allocation5], %s508_s28, %s508_s28, %s509_s29  }
  0x1d   :  { %504 = dma.done.wait [#allocation5], 384  }
  0x1e   :  { %505 = vsyncadd [#allocation5], 4294966912  ;;  %v510_v0 = vmov 0   ;;  %s47_s4 = sld [smem:[#allocation3]]  ;;  %v511_v1 = vmov 2   ;;  %vm56_vm0 = vcmask 1040384  }
  0x1f   :  { %423 = vset.pattern.permute.xlu0 %v510_v0  ;;  %s395_s5 = sld [smem:[#allocation3 + $0x80]]  ;;  %425 = vset.pattern.permute.xlu1 %v511_v1  ;;  %v555_v2 = vld [vmem:[#allocation4 + $0xa] ss:$0 sm:$0xff]  ;;  %v557_v3 = vld [vmem:[#allocation4 + $0xb] ss:$0 sm:$0xff]  ;;  %v512_v19 = vmov 1  }
  0x20   :  { %v58_v6 = vmul.f32 0.0, %v555_v2  ;;  %v560_v7 = vld [vmem:[#allocation4 + $0xc] ss:$0 sm:$0xff]  ;;  %v60_v9 = vmul.f32 0.0, %v557_v3  ;;  %v563_v10 = vld [vmem:[#allocation4 + $0xd] ss:$0 sm:$0xff] }
  0x21   :  { %v62_v13 = vmul.f32 0.0, %v560_v7  ;;  %v64_v15 = vmul.f32 0.0, %v563_v10  ;;  %v513_v20 = vmov 3   ;;  %s397_s1 = sld [smem:[#allocation3 + $0x81]]  ;;  %s399_s11 = sld [smem:[#allocation3 + $0x82]] }
  0x22   :  { %s396_s8 = sld [smem:[#allocation3 + $0x1]]  ;;  %s398_s12 = sld [smem:[#allocation3 + $0x2]] }
  0x23   :  { %s401_s15 = sld [smem:[#allocation3 + $0x83]]  ;;  %s403_s19 = sld [smem:[#allocation3 + $0x84]] }
  0x24   :  { %s48_s6 = scalar_lea.vmem [#allocation4], %s47_s4  ;;  %s400_s16 = sld [smem:[#allocation3 + $0x3]] }
  0x25   :  { %v49_v4 = vld [vmem:[%s48_s6] sm:$0x1]  ;;  %s51_s7 = scalar_lea.vmem [#allocation4], %s395_s5  ;;  %s402_s20 = sld [smem:[#allocation3 + $0x4]] }
  0x26   :  { %v52_v5 = vld [vmem:[%s51_s7] sm:$0x1]  ;;  %s405_s23 = sld [smem:[#allocation3 + $0x85]]  ;;  %s407_s27 = sld [smem:[#allocation3 + $0x86]] }
  0x27   :  { %v54_v8 = vrot.slane %v52_v5, 7  ;;  %s71_s9 = scalar_lea.vmem [#allocation4], %s397_s1  ;;  %s107_s13 = scalar_lea.vmem [#allocation4], %s399_s11 }
  0x28   :  { %v72_v21 = vld [vmem:[%s71_s9] sm:$0x1]  ;;  %s68_s10 = scalar_lea.vmem [#allocation4], %s396_s8  ;;  %s104_s14 = scalar_lea.vmem [#allocation4], %s398_s12 }
  0x29   :  { %v57_v11 = vsel %vm56_vm0, %v49_v4, %v54_v8  ;;  %v74_v22 = vrot.slane %v72_v21, 7  ;;  %v69_v23 = vld [vmem:[%s68_s10] sm:$0x1]  ;;  %s143_s17 = scalar_lea.vmem [#allocation4], %s401_s15  ;;  %s179_s21 = scalar_lea.vmem [#allocation4], %s403_s19 }
  0x2a   :  { %v59_v12 = vadd.f32 %v58_v6, %v57_v11  ;;  %v108_v38 = vld [vmem:[%s107_s13] sm:$0x1]  ;;  %s140_s18 = scalar_lea.vmem [#allocation4], %s400_s16  ;;  %s404_s24 = sld [smem:[#allocation3 + $0x5]] }
  0x2b   :  { %v76_v27 = vsel %vm56_vm0, %v69_v23, %v74_v22  ;;  %v110_v39 = vrot.slane %v108_v38, 7  ;;  %v105_v40 = vld [vmem:[%s104_s14] sm:$0x1]  ;;  %s176_s22 = scalar_lea.vmem [#allocation4], %s402_s20  ;;  %s406_s0 = sld [smem:[#allocation3 + $0x6]] }
  0x2c   :  { %v61_v14 = vadd.f32 %v60_v9, %v59_v12  ;;  %v144_v55 = vld [vmem:[%s143_s17] sm:$0x1]  ;;  %s215_s25 = scalar_lea.vmem [#allocation4], %s405_s23  ;;  %s251_s28 = scalar_lea.vmem [#allocation4], %s407_s27 }
  0x2d   :  { %v112_v42 = vsel %vm56_vm0, %v105_v40, %v110_v39  ;;  %v146_v56 = vrot.slane %v144_v55, 7  ;;  %v141_v57 = vld [vmem:[%s140_s18] sm:$0x1]  ;;  %s409_s30 = sld [smem:[#allocation3 + $0x87]] }
  0x2e   :  { %v63_v16 = vadd.f32 %v62_v13, %v61_v14  ;;  %v180_v14 = vld [vmem:[%s179_s21] sm:$0x1]  ;;  %s408_s3 = sld [smem:[#allocation3 + $0x7]] }
  0x2f   :  { %v148_v60 = vsel %vm56_vm0, %v141_v57, %v146_v56 }
  0x30   :  { %v65_v17 = vadd.f32 %v64_v15, %v63_v16  ;;  %v182_v15 = vrot.slane %v180_v14, 7  ;;  %v177_v16 = vld [vmem:[%s176_s22] sm:$0x1]  ;;  %s212_s26 = scalar_lea.vmem [#allocation4], %s404_s24 }
  0x31   :  { %s248_s29 = scalar_lea.vmem [#allocation4], %s406_s0 }
  0x32   :  { %454 = vtanh.f32 %v65_v17  ;;  %v184_v17 = vsel %vm56_vm0, %v177_v16, %v182_v15 }
  0x33   :  { %s287_s4 = scalar_lea.vmem [#allocation4], %s409_s30 }
  0x34   :  { %s284_s5 = scalar_lea.vmem [#allocation4], %s408_s3 }
  0x3c   :  { %v455_v18 = vpop.eup %454 }
  0x3d   :  { %79 = vperm.xlu0 %423, %v455_v18   ;;  %91 = vperm.xlu1 %425, %v455_v18  }
  0x41   :  { %424 = vset.pattern.permute.xlu0 %v512_v19  ;;  %426 = vset.pattern.permute.xlu1 %v513_v20 }
  0x42   :  { %85 = vperm.xlu0 %424, %v455_v18   ;;  %97 = vperm.xlu1 %426, %v455_v18  }
  0x46   :  { %427 = vset.pattern.permute.xlu1 %v510_v0 }
  0xbc   :  { %v80_v24 = vpop.permute.xlu0 %79  ;;  %v92_v25 = vpop.permute.xlu1 %91 }
  0xbd   :  { %v82_v26 = vmul.f32 %v555_v2, %v80_v24  ;;  %v94_v32 = vmul.f32 %v560_v7, %v92_v25 }
  0xbf   :  { %v83_v30 = vadd.f32 %v82_v26, %v76_v27 }
  0xc1   :  { %v86_v28 = vpop.permute.xlu0 %85  ;;  %v98_v29 = vpop.permute.xlu1 %97 }
  0xc2   :  { %v88_v31 = vmul.f32 %v557_v3, %v86_v28  ;;  %v100_v34 = vmul.f32 %v563_v10, %v98_v29 }
  0xc4   :  { %v89_v33 = vadd.f32 %v88_v31, %v83_v30 }
  0xc6   :  { %v95_v35 = vadd.f32 %v94_v32, %v89_v33  ;;  %v216_v33 = vld [vmem:[%s215_s25] sm:$0x1] }
  0xc8   :  { %v101_v36 = vadd.f32 %v100_v34, %v95_v35  ;;  %v218_v34 = vrot.slane %v216_v33, 7  ;;  %v213_v35 = vld [vmem:[%s212_s26] sm:$0x1]  ;;  %v414_v33 = vld [vmem:[#allocation4 + $0x11] ss:$0 sm:$0xff] }
  0xca   :  { %456 = vtanh.f32 %v101_v36 }
  0xd4   :  { %v457_v37 = vpop.eup %456 }
  0xd5   :  { %121 = vperm.xlu0 %424, %v457_v37   ;;  %115 = vperm.xlu1 %427, %v457_v37  }
  0xd9   :  { %429 = vset.pattern.permute.xlu0 %v513_v20  ;;  %428 = vset.pattern.permute.xlu1 %v511_v1 }
  0xda   :  { %133 = vperm.xlu0 %429, %v457_v37   ;;  %127 = vperm.xlu1 %428, %v457_v37   ;;  %v220_v37 = vsel %vm56_vm0, %v213_v35, %v218_v34 }
  0xde   :  { %432 = vset.pattern.permute.xlu0 %v511_v1  ;;  %430 = vset.pattern.permute.xlu1 %v510_v0 }
 0x154   :  { %v122_v41 = vpop.permute.xlu0 %121  ;;  %v116_v43 = vpop.permute.xlu1 %115 }
 0x155   :  { %v118_v44 = vmul.f32 %v555_v2, %v116_v43  ;;  %v124_v45 = vmul.f32 %v557_v3, %v122_v41 }
 0x157   :  { %v119_v46 = vadd.f32 %v118_v44, %v112_v42 }
 0x159   :  { %v134_v47 = vpop.permute.xlu0 %133  ;;  %v125_v48 = vadd.f32 %v124_v45, %v119_v46  ;;  %v128_v49 = vpop.permute.xlu1 %127 }
 0x15a   :  { %v130_v50 = vmul.f32 %v560_v7, %v128_v49  ;;  %v136_v51 = vmul.f32 %v563_v10, %v134_v47 }
 0x15c   :  { %v131_v52 = vadd.f32 %v130_v50, %v125_v48  ;;  %v252_v50 = vld [vmem:[%s251_s28] sm:$0x1] }
 0x15e   :  { %v137_v53 = vadd.f32 %v136_v51, %v131_v52  ;;  %v254_v51 = vrot.slane %v252_v50, 7  ;;  %v249_v52 = vld [vmem:[%s248_s29] sm:$0x1] }
 0x160   :  { %458 = vtanh.f32 %v137_v53  ;;  %v256_v55 = vsel %vm56_vm0, %v249_v52, %v254_v51 }
 0x16a   :  { %v459_v54 = vpop.eup %458 }
 0x16b   :  { %163 = vperm.xlu0 %432, %v459_v54   ;;  %151 = vperm.xlu1 %430, %v459_v54  }
 0x16f   :  { %431 = vset.pattern.permute.xlu1 %v512_v19  ;;  %435 = vset.pattern.permute.xlu0 %v512_v19 }
 0x170   :  { %157 = vperm.xlu1 %431, %v459_v54  }
 0x174   :  { %433 = vset.pattern.permute.xlu1 %v513_v20 }
 0x175   :  { %169 = vperm.xlu1 %433, %v459_v54  }
 0x179   :  { %434 = vset.pattern.permute.xlu1 %v510_v0 }
 0x1ea   :  { %v152_v58 = vpop.permute.xlu1 %151  ;;  %v164_v61 = vpop.permute.xlu0 %163 }
 0x1eb   :  { %v154_v59 = vmul.f32 %v555_v2, %v152_v58  ;;  %v166_v5 = vmul.f32 %v560_v7, %v164_v61 }
 0x1ed   :  { %v155_v63 = vadd.f32 %v154_v59, %v148_v60 }
 0x1ef   :  { %v158_v62 = vpop.permute.xlu1 %157 }
 0x1f0   :  { %v160_v4 = vmul.f32 %v557_v3, %v158_v62 }
 0x1f2   :  { %v161_v6 = vadd.f32 %v160_v4, %v155_v63 }
 0x1f4   :  { %v167_v8 = vadd.f32 %v166_v5, %v161_v6  ;;  %v170_v9 = vpop.permute.xlu1 %169 }
 0x1f5   :  { %v172_v11 = vmul.f32 %v563_v10, %v170_v9 }
 0x1f7   :  { %v173_v12 = vadd.f32 %v172_v11, %v167_v8  ;;  %v288_v8 = vld [vmem:[%s287_s4] sm:$0x1] }
 0x1f8   :  { %v290_v9 = vrot.slane %v288_v8, 7  ;;  %v285_v11 = vld [vmem:[%s284_s5] sm:$0x1] }
 0x1f9   :  { %460 = vtanh.f32 %v173_v12 }
 0x1fa   :  { %v292_v12 = vsel %vm56_vm0, %v285_v11, %v290_v9 }
 0x203   :  { %v461_v13 = vpop.eup %460 }
 0x204   :  { %193 = vperm.xlu0 %435, %v461_v13   ;;  %187 = vperm.xlu1 %434, %v461_v13  }
 0x208   :  { %436 = vset.pattern.permute.xlu1 %v511_v1  ;;  %438 = vset.pattern.permute.xlu0 %v510_v0 }
 0x209   :  { %199 = vperm.xlu1 %436, %v461_v13  }
 0x20d   :  { %437 = vset.pattern.permute.xlu1 %v513_v20 }
 0x20e   :  { %205 = vperm.xlu1 %437, %v461_v13  }
 0x212   :  { %439 = vset.pattern.permute.xlu1 %v512_v19 }
 0x283   :  { %v188_v18 = vpop.permute.xlu1 %187  ;;  %v194_v22 = vpop.permute.xlu0 %193 }
 0x284   :  { %v190_v21 = vmul.f32 %v555_v2, %v188_v18  ;;  %v196_v24 = vmul.f32 %v557_v3, %v194_v22 }
 0x286   :  { %v191_v23 = vadd.f32 %v190_v21, %v184_v17 }
 0x288   :  { %v200_v25 = vpop.permute.xlu1 %199  ;;  %v197_v26 = vadd.f32 %v196_v24, %v191_v23 }
 0x289   :  { %v202_v27 = vmul.f32 %v560_v7, %v200_v25 }
 0x28b   :  { %v203_v29 = vadd.f32 %v202_v27, %v197_v26  ;;  %v410_v27 = vld [vmem:[#allocation4 + $0x12] ss:$0 sm:$0xff] }
 0x28d   :  { %v206_v28 = vpop.permute.xlu1 %205 }
 0x28e   :  { %v208_v30 = vmul.f32 %v563_v10, %v206_v28 }
 0x290   :  { %v209_v31 = vadd.f32 %v208_v30, %v203_v29 }
 0x292   :  { %462 = vtanh.f32 %v209_v31 }
 0x29c   :  { %v463_v32 = vpop.eup %462 }
 0x29d   :  { %229 = vperm.xlu1 %439, %v463_v32   ;;  %223 = vperm.xlu0 %438, %v463_v32  }
 0x2a1   :  { %440 = vset.pattern.permute.xlu1 %v511_v1  ;;  %441 = vset.pattern.permute.xlu0 %v513_v20 }
 0x2a2   :  { %235 = vperm.xlu1 %440, %v463_v32   ;;  %241 = vperm.xlu0 %441, %v463_v32  }
 0x2a6   :  { %442 = vset.pattern.permute.xlu1 %v510_v0  ;;  %444 = vset.pattern.permute.xlu0 %v511_v1 }
 0x31c   :  { %v230_v36 = vpop.permute.xlu1 %229  ;;  %v224_v38 = vpop.permute.xlu0 %223 }
 0x31d   :  { %v226_v39 = vmul.f32 %v555_v2, %v224_v38  ;;  %v232_v40 = vmul.f32 %v557_v3, %v230_v36 }
 0x31f   :  { %v227_v41 = vadd.f32 %v226_v39, %v220_v37 }
 0x321   :  { %v236_v42 = vpop.permute.xlu1 %235  ;;  %v233_v43 = vadd.f32 %v232_v40, %v227_v41  ;;  %v242_v44 = vpop.permute.xlu0 %241 }
 0x322   :  { %v238_v45 = vmul.f32 %v560_v7, %v236_v42  ;;  %v244_v47 = vmul.f32 %v563_v10, %v242_v44 }
 0x324   :  { %v239_v46 = vadd.f32 %v238_v45, %v233_v43 }
 0x326   :  { %v245_v48 = vadd.f32 %v244_v47, %v239_v46 }
 0x328   :  { %464 = vtanh.f32 %v245_v48 }
 0x332   :  { %v465_v49 = vpop.eup %464 }
 0x333   :  { %271 = vperm.xlu0 %444, %v465_v49   ;;  %259 = vperm.xlu1 %442, %v465_v49  }
 0x337   :  { %443 = vset.pattern.permute.xlu1 %v512_v19  ;;  %447 = vset.pattern.permute.xlu0 %v512_v19 }
 0x338   :  { %265 = vperm.xlu1 %443, %v465_v49  }
 0x33c   :  { %445 = vset.pattern.permute.xlu1 %v513_v20 }
 0x33d   :  { %277 = vperm.xlu1 %445, %v465_v49  }
 0x341   :  { %446 = vset.pattern.permute.xlu1 %v510_v0 }
 0x3b2   :  { %v260_v53 = vpop.permute.xlu1 %259  ;;  %v272_v56 = vpop.permute.xlu0 %271 }
 0x3b3   :  { %v262_v54 = vmul.f32 %v555_v2, %v260_v53  ;;  %v274_v60 = vmul.f32 %v560_v7, %v272_v56 }
 0x3b5   :  { %v263_v58 = vadd.f32 %v262_v54, %v256_v55 }
 0x3b7   :  { %v266_v57 = vpop.permute.xlu1 %265 }
 0x3b8   :  { %v268_v59 = vmul.f32 %v557_v3, %v266_v57 }
 0x3ba   :  { %v269_v61 = vadd.f32 %v268_v59, %v263_v58 }
 0x3bc   :  { %v275_v62 = vadd.f32 %v274_v60, %v269_v61  ;;  %v278_v63 = vpop.permute.xlu1 %277 }
 0x3bd   :  { %v280_v4 = vmul.f32 %v563_v10, %v278_v63 }
 0x3bf   :  { %v281_v5 = vadd.f32 %v280_v4, %v275_v62 }
 0x3c1   :  { %466 = vtanh.f32 %v281_v5 }
 0x3cb   :  { %v467_v6 = vpop.eup %466 }
 0x3cc   :  { %301 = vperm.xlu0 %447, %v467_v6   ;;  %295 = vperm.xlu1 %446, %v467_v6  }
 0x3d0   :  { %448 = vset.pattern.permute.xlu1 %v511_v1  ;;  %450 = vset.pattern.permute.xlu0 %v510_v0 }
 0x3d1   :  { %307 = vperm.xlu1 %448, %v467_v6  }
 0x3d5   :  { %449 = vset.pattern.permute.xlu1 %v513_v20 }
 0x3d6   :  { %313 = vperm.xlu1 %449, %v467_v6  }
 0x3da   :  { %451 = vset.pattern.permute.xlu1 %v512_v19 }
 0x44b   :  { %v296_v13 = vpop.permute.xlu1 %295  ;;  %v302_v15 = vpop.permute.xlu0 %301 }
 0x44c   :  { %v298_v14 = vmul.f32 %v555_v2, %v296_v13  ;;  %v304_v16 = vmul.f32 %v557_v3, %v302_v15  ;;  %v411_v2 = vld [vmem:[#allocation4 + $0xe] ss:$0 sm:$0xff]  ;;  %v412_v3 = vld [vmem:[#allocation4 + $0xf] ss:$0 sm:$0xff] }
 0x44e   :  { %v299_v0 = vadd.f32 %v298_v14, %v292_v12 }
 0x450   :  { %v308_v17 = vpop.permute.xlu1 %307  ;;  %v305_v18 = vadd.f32 %v304_v16, %v299_v0 }
 0x451   :  { %v310_v19 = vmul.f32 %v560_v7, %v308_v17 }
 0x453   :  { %v311_v22 = vadd.f32 %v310_v19, %v305_v18 }
 0x455   :  { %v314_v21 = vpop.permute.xlu1 %313 }
 0x456   :  { %v316_v23 = vmul.f32 %v563_v10, %v314_v21  ;;  %v413_v10 = vld [vmem:[#allocation4 + $0x10] ss:$0 sm:$0xff] }
 0x458   :  { %v317_v24 = vadd.f32 %v316_v23, %v311_v22 }
 0x45a   :  { %468 = vtanh.f32 %v317_v24 }
 0x464   :  { %v469_v25 = vpop.eup %468 }
 0x465   :  { %338 = vperm.xlu1 %451, %v469_v25   ;;  %327 = vperm.xlu0 %450, %v469_v25  }
 0x469   :  { %452 = vset.pattern.permute.xlu1 %v511_v1  ;;  %453 = vset.pattern.permute.xlu0 %v513_v20 }
 0x46a   :  { %349 = vperm.xlu1 %452, %v469_v25   ;;  %360 = vperm.xlu0 %453, %v469_v25  }
 0x4e4   :  { %v339_v26 = vpop.permute.xlu1 %338  ;;  %v328_v7 = vpop.permute.xlu0 %327 }
 0x4e5   :  { %v334_v28 = vmul.f32 %v411_v2, %v328_v7  ;;  %v345_v29 = vmul.f32 %v412_v3, %v339_v26 }
 0x4e7   :  { %v335_v30 = vadd.f32 %v410_v27, %v334_v28 }
 0x4e9   :  { %v350_v31 = vpop.permute.xlu1 %349  ;;  %v346_v32 = vadd.f32 %v345_v29, %v335_v30  ;;  %v361_v34 = vpop.permute.xlu0 %360 }
 0x4ea   :  { %v356_v35 = vmul.f32 %v413_v10, %v350_v31  ;;  %v367_v1 = vmul.f32 %v414_v33, %v361_v34 }
 0x4ec   :  { %v357_v36 = vadd.f32 %v356_v35, %v346_v32 }
 0x4ee   :  { %v368_v37 = vadd.f32 %v367_v1, %v357_v36 }
 0x4f0   :  { %369 = vst [vmem:[%s637_s2] sm:$0x3] %v368_v37 }
 0x4f1   :  { %374 = vsyncpa [#allocation5], 1 }

</bundles_post_ra>
